<compile_context>
chip_gen: v5e
topology: v5e:2x2
jax: 0.10.0
libtpu: 0.0.40
codegen_flags: <defaults>
</compile_context>

<pallas_src>
import functools

import jax
import jax.numpy as jnp
from jax.experimental import pallas as pl
from jax.experimental.pallas import tpu as pltpu


def _round_up(n: int, m: int) -> int:
    return ((n + m - 1) // m) * m


def _choose_row_tile(rows: int, block_rows: int) -> int:
    """Pick the packed-row tile: big, multiple of 8 (or full), >=2 grid steps."""
    block_rows = min(max(block_rows, 8), 8192)  # keep double-buffered tiles in VMEM
    if rows < 16:
        return rows                              # single block covering everything
    tr = _round_up(min(block_rows, rows), 8)
    # Ensure at least two grid steps so both v7x TensorCores get work.
    tr = min(tr, _round_up(pl.cdiv(rows, 2), 8))
    return max(8, tr)


def iris_mlp_kernel(x_ref, w1_ref, b1_ref, w2_ref, b2_ref, o_ref):
    # Packed-lane layout (group g = 32 samples per row):
    #   x_ref : (TR, 128)  row r, lane 4*i + j  = x[32*r + i, j]
    #   w1_ref: (128, 320) = kron(I_32, W1)     b1_ref: (1, 320) = tile(b1, 32)
    #   w2_ref: (320,  96) = kron(I_32, W2)     b2_ref: (1,  96) = tile(b2, 32)
    #   o_ref : (TR,  96)  row r, lane 3*i + m  = y[32*r + i, m]
    x = x_ref[...]
    h = jnp.dot(x, w1_ref[...], preferred_element_type=jnp.float32) + b1_ref[...]
    h = jnp.maximum(h, 0.0)                                          # ReLU
    y = jnp.dot(h, w2_ref[...], preferred_element_type=jnp.float32) + b2_ref[...]
    o_ref[...] = y.astype(o_ref.dtype)


@functools.partial(jax.jit, static_argnames=("block_rows",))
def iris_forward(x, w1, b1, w2, b2, *, block_rows: int = 4096):
    """x: (B, in_dim) f32 -> (B, out_dim) f32; y = relu(x @ w1 + b1) @ w2 + b2."""
    B, in_dim = x.shape
    hidden_dim = w1.shape[1]
    out_dim = w2.shape[1]

    group = max(1, 128 // in_dim)          # 32 samples per packed row for in_dim=4
    lanes_in = group * in_dim              # 128 -> fully lane-dense input tiles
    lanes_hid = group * hidden_dim         # 320
    lanes_out = group * out_dim            # 96  -> lane-dense output tiles

    # Pack the batch into lane-dense rows.  For B % group == 0 this is a pure
    # row-major reshape (no data movement); otherwise a small tail pad.
    b_pad = _round_up(B, group)
    if b_pad != B:
        x = jnp.pad(x, ((0, b_pad - B), (0, 0)))
    rows = b_pad // group
    x_p = x.reshape(rows, lanes_in)

    # Block-diagonal weights / tiled biases so the packed layout is consumed
    # directly by the MXU.  Tiny (160 KB + 120 KB), VMEM-resident across the
    # whole grid; in a real deployment these would be precomputed once.
    w1_big = jnp.kron(jnp.eye(group, dtype=w1.dtype), w1)   # (128, 320)
    w2_big = jnp.kron(jnp.eye(group, dtype=w2.dtype), w2)   # (320,  96)
    b1_big = jnp.tile(b1, group).reshape(1, lanes_hid)      # (1, 320)
    b2_big = jnp.tile(b2, group).reshape(1, lanes_out)      # (1,  96)

    tr = _choose_row_tile(rows, block_rows)
    grid = (pl.cdiv(rows, tr),)            # ragged last block handled by Pallas

    out_p = pl.pallas_call(
        iris_mlp_kernel,
        out_shape=jax.ShapeDtypeStruct((rows, lanes_out), jnp.float32),
        grid=grid,
        in_specs=[
            pl.BlockSpec((tr, lanes_in), lambda i: (i, 0)),          # x: streamed
            pl.BlockSpec((lanes_in, lanes_hid), lambda i: (0, 0)),   # W1_big: resident
            pl.BlockSpec((1, lanes_hid), lambda i: (0, 0)),          # b1: resident
            pl.BlockSpec((lanes_hid, lanes_out), lambda i: (0, 0)),  # W2_big: resident
            pl.BlockSpec((1, lanes_out), lambda i: (0, 0)),          # b2: resident
        ],
        out_specs=pl.BlockSpec((tr, lanes_out), lambda i: (i, 0)),
        compiler_params=pltpu.CompilerParams(
            dimension_semantics=("parallel",),
            vmem_limit_bytes=40 * 1024 * 1024,
        ),
    )(x_p, w1_big, b1_big, w2_big, b2_big)

    out = out_p.reshape(b_pad, out_dim)    # free row-major un-packing
    return out if b_pad == B else out[:B]


def init_params(key, input_dim=4, hidden_dim=10, output_dim=3):
    # Deterministic synthetic init; weights stored as (in, out) so that
    # y = x @ W + b matches PyTorch's x @ W_pt.T + b_pt.
    k1, k2, k3, k4 = jax.random.split(key, 4)
    w1 = jax.random.normal(k1, (input_dim, hidden_dim), jnp.float32) * 0.5
    b1 = jax.random.normal(k2, (hidden_dim,), jnp.float32) * 0.1
    w2 = jax.random.normal(k3, (hidden_dim, output_dim), jnp.float32) * 0.5
    b2 = jax.random.normal(k4, (output_dim,), jnp.float32) * 0.1
    return w1, b1, w2, b2


if __name__ == "__main__":
    key = jax.random.PRNGKey(0)
    kp, kx1, kx2, kx3 = jax.random.split(key, 4)

    input_dim, hidden_dim, output_dim = 4, 10, 3
    w1, b1, w2, b2 = init_params(kp, input_dim, hidden_dim, output_dim)

    hp = jax.lax.Precision.HIGHEST

    def ref_fwd(xx):
        h = jnp.maximum(jnp.dot(xx, w1, precision=hp) + b1, 0.0)
        return jnp.dot(h, w2, precision=hp) + b2

    # 1) Small deployment-sized batch: single packed row, single grid step.
    x_small = jax.random.normal(kx1, (8, input_dim), jnp.float32)
    y_small = jax.block_until_ready(iris_forward(x_small, w1, b1, w2, b2))
    assert y_small.shape == (8, output_dim)
    assert jnp.allclose(y_small, ref_fwd(x_small), atol=1e-4, rtol=1e-4)

    # 2) Ragged batch (300 rows): exercises the pad-to-32 packing path and a
    #    ragged (partial) grid block.
    x_mid = jax.random.normal(kx2, (300, input_dim), jnp.float32)
    y_mid = jax.block_until_ready(iris_forward(x_mid, w1, b1, w2, b2))
    assert y_mid.shape == (300, output_dim)
    assert jnp.allclose(y_mid, ref_fwd(x_mid), atol=1e-4, rtol=1e-4)

    # 3) Larger multiple-of-32 batch: free-reshape packing, multi-step grid
    #    (>=2 steps for v7x megacore), VMEM-resident block-diagonal weights.
    x_big = jax.random.normal(kx3, (4096, input_dim), jnp.float32)
    y_big = jax.block_until_ready(
        iris_forward(x_big, w1, b1, w2, b2, block_rows=32))
    assert y_big.shape == (4096, output_dim)
    assert jnp.allclose(y_big, ref_fwd(x_big), atol=1e-4, rtol=1e-4)

    print("KERNEL_OK")
</pallas_src>

<mosaic_0001>
module attributes {stable_mosaic.version = 11 : i64} {
  func.func @iris_mlp_kernel(%arg0: i32, %arg1: memref<1x128xf32, #tpu.memory_space<vmem>>, %arg2: memref<128x320xf32, #tpu.memory_space<vmem>>, %arg3: memref<1x320xf32, #tpu.memory_space<vmem>>, %arg4: memref<320x96xf32, #tpu.memory_space<vmem>>, %arg5: memref<1x96xf32, #tpu.memory_space<vmem>>, %arg6: memref<1x96xf32, #tpu.memory_space<vmem>>) attributes {dimension_semantics = [#tpu.dimension_semantics<parallel>], iteration_bounds = array<i64: 1>, scalar_prefetch = 0 : i64, scratch_operands = 0 : i64, tpu.core_type = #tpu.core_type<tc>, window_params = [{transform_indices = @transform_0, window_bounds = array<i64: 1, 128>}, {pipeline_mode = #tpu.pipeline_mode<synchronous>, transform_indices = @transform_1, window_bounds = array<i64: 128, 320>}, {pipeline_mode = #tpu.pipeline_mode<synchronous>, transform_indices = @transform_2, window_bounds = array<i64: 1, 320>}, {pipeline_mode = #tpu.pipeline_mode<synchronous>, transform_indices = @transform_3, window_bounds = array<i64: 320, 96>}, {pipeline_mode = #tpu.pipeline_mode<synchronous>, transform_indices = @transform_4, window_bounds = array<i64: 1, 96>}, {transform_indices = @transform_5, window_bounds = array<i64: 1, 96>}]} {
    %c0 = arith.constant 0 : index
    %c0_0 = arith.constant 0 : index
    %0 = vector.load %arg1[%c0, %c0_0] : memref<1x128xf32, #tpu.memory_space<vmem>>, vector<1x128xf32>
    %c0_1 = arith.constant 0 : index
    %c0_2 = arith.constant 0 : index
    %1 = vector.load %arg2[%c0_1, %c0_2] : memref<128x320xf32, #tpu.memory_space<vmem>>, vector<128x320xf32>
    %cst = arith.constant dense<0.000000e+00> : vector<1x320xf32>
    %2 = tpu.matmul %0, %1, %cst {dimension_numbers = #tpu.dot_dimension_numbers<[1], [0], [0], [1], [0, 0, 1, 1], [], []>} : vector<1x128xf32>, vector<128x320xf32>, vector<1x320xf32> -> vector<1x320xf32>
    %c0_3 = arith.constant 0 : index
    %c0_4 = arith.constant 0 : index
    %3 = vector.load %arg3[%c0_3, %c0_4] : memref<1x320xf32, #tpu.memory_space<vmem>>, vector<1x320xf32>
    %4 = arith.addf %2, %3 : vector<1x320xf32>
    %cst_5 = arith.constant 0.000000e+00 : f32
    %5 = vector.broadcast %cst_5 : f32 to vector<1x320xf32>
    %6 = arith.maximumf %4, %5 : vector<1x320xf32>
    %c0_6 = arith.constant 0 : index
    %c0_7 = arith.constant 0 : index
    %7 = vector.load %arg4[%c0_6, %c0_7] : memref<320x96xf32, #tpu.memory_space<vmem>>, vector<320x96xf32>
    %cst_8 = arith.constant dense<0.000000e+00> : vector<1x96xf32>
    %8 = tpu.matmul %6, %7, %cst_8 {dimension_numbers = #tpu.dot_dimension_numbers<[1], [0], [0], [1], [0, 0, 1, 1], [], []>} : vector<1x320xf32>, vector<320x96xf32>, vector<1x96xf32> -> vector<1x96xf32>
    %c0_9 = arith.constant 0 : index
    %c0_10 = arith.constant 0 : index
    %9 = vector.load %arg5[%c0_9, %c0_10] : memref<1x96xf32, #tpu.memory_space<vmem>>, vector<1x96xf32>
    %10 = arith.addf %8, %9 : vector<1x96xf32>
    %c0_11 = arith.constant 0 : index
    %c0_12 = arith.constant 0 : index
    %11 = vector.load %arg6[%c0_11, %c0_12] : memref<1x96xf32, #tpu.memory_space<vmem>>, vector<1x96xf32>
    tpu.vector_store %arg6[%c0_11, %c0_12], %10 {strides = array<i32>} : memref<1x96xf32, #tpu.memory_space<vmem>>, vector<1x96xf32>,
    return
  }
  func.func @transform_0(%arg0: i32) -> (i32, i32) {
    %c0_i32 = arith.constant 0 : i32
    %c0_i32_0 = arith.constant 0 : i32
    return %arg0, %c0_i32 : i32, i32
  }
  func.func @transform_1(%arg0: i32) -> (i32, i32) {
    %c0_i32 = arith.constant 0 : i32
    %c0_i32_0 = arith.constant 0 : i32
    %c0_i32_1 = arith.constant 0 : i32
    return %c0_i32, %c0_i32_0 : i32, i32
  }
  func.func @transform_2(%arg0: i32) -> (i32, i32) {
    %c0_i32 = arith.constant 0 : i32
    %c0_i32_0 = arith.constant 0 : i32
    %c0_i32_1 = arith.constant 0 : i32
    return %c0_i32, %c0_i32_0 : i32, i32
  }
  func.func @transform_3(%arg0: i32) -> (i32, i32) {
    %c0_i32 = arith.constant 0 : i32
    %c0_i32_0 = arith.constant 0 : i32
    %c0_i32_1 = arith.constant 0 : i32
    return %c0_i32, %c0_i32_0 : i32, i32
  }
  func.func @transform_4(%arg0: i32) -> (i32, i32) {
    %c0_i32 = arith.constant 0 : i32
    %c0_i32_0 = arith.constant 0 : i32
    %c0_i32_1 = arith.constant 0 : i32
    return %c0_i32, %c0_i32_0 : i32, i32
  }
  func.func @transform_5(%arg0: i32) -> (i32, i32) {
    %c0_i32 = arith.constant 0 : i32
    %c0_i32_0 = arith.constant 0 : i32
    return %arg0, %c0_i32 : i32, i32
  }
}

</mosaic_0001>

<bundles_post_ra>
// kernel: tile.13
= control target key start
LH: loop header
LB: loop body
LE: loop exit
PB: predicated region body
PF: predicated region fallthrough
CT: control target
= control target key end

     0   :  { %s40_s0 = inlined_call_operand.vmem [shape: f32[10], index: 0, kind: input, shape index: {}]   ;;  %s41_s1 = inlined_call_operand.vmem [shape: f32[32,10], index: 1, kind: output, shape index: {}]  }
   0x1   :  { %v4_v0 = vld [vmem:[%s40_s0] ss:$0 sm:$0xff] }
   0x2   :  { %5 = vst [vmem:[%s41_s1] sm:$0xff] %v4_v0 }
   0x3   :  { %12 = vst [vmem:[%s41_s1 + $0x8] sm:$0xff] %v4_v0 }
   0x4   :  { %13 = vst [vmem:[%s41_s1 + $0x10] sm:$0xff] %v4_v0 }
   0x5   :  { %14 = vst [vmem:[%s41_s1 + $0x18] sm:$0xff] %v4_v0 }

// kernel: tile.14
= control target key start
LH: loop header
LB: loop body
LE: loop exit
PB: predicated region body
PF: predicated region fallthrough
CT: control target
= control target key end

     0   :  { %vm9_vm0 = vcmask 48128   ;;  %s308_s12 = smov 122   ;;  %s309_s13 = smov 112   ;;  %vm23_vm1 = vcmask 64512   ;;  %vm3_vm2 = vcmask 80896   ;;  %vm13_vm3 = vcmask 31744   ;;  %s460_s0 = inlined_call_operand.vmem [shape: f32[32,10], index: 0, kind: input, shape index: {}]   ;;  %s461_s1 = inlined_call_operand.vmem [shape: f32[1,320], index: 1, kind: output, shape index: {}]  }
   0x1   :  { %v242_v0 = vld [vmem:[%s460_s0 + $0x19] sm:$0x1]   ;;  %v246_v3 = vld [vmem:[%s460_s0 + $0x18] sm:$0x1]   ;;  %v244_v4 = vld [vmem:[%s460_s0 + $0xc] sm:$0x1]  }
   0x2   :  { %v243_v1 = vld [vmem:[%s460_s0 + $0x19] sm:$0x1]   ;;  %34 = vrot.lane.b32.xlu1 %v246_v3, %s309_s13  ;;  %v245_v5 = vld [vmem:[%s460_s0 + $0xc] sm:$0x1]   ;;  %v248_v6 = vld [vmem:[%s460_s0 + $0x17] sm:$0x1]  }
   0x3   :  { %v10_v2 = vsel %vm9_vm0, %v243_v1, %v242_v0  ;;  %s310_s20 = smov 102   ;;  %v24_v7 = vsel %vm23_vm1, %v245_v5, %v244_v4  ;;  %v247_v8 = vld [vmem:[%s460_s0 + $0xb] sm:$0x1]   ;;  %s311_s23 = smov 120   ;;  %v249_v9 = vld [vmem:[%s460_s0 + $0xa] sm:$0x1]  }
   0x4   :  { %11 = vrot.lane.b32.xlu0 %v10_v2, %s308_s12  ;;  %47 = vrot.lane.b32.xlu2 %v248_v6, %s310_s20  ;;  %s312_s24 = smov 110   ;;  %s313_s27 = smov 100   ;;  %v250_v10 = vld [vmem:[%s460_s0 + $0x16] sm:$0x1]   ;;  %v251_v11 = vld [vmem:[%s460_s0 + $0x9] sm:$0x1]  }
   0x5   :  { %s314_s3 = smov 92   ;;  %s315_s4 = smov 90   ;;  %v252_v12 = vld [vmem:[%s460_s0 + $0x15] sm:$0x1]   ;;  %v253_v13 = vld [vmem:[%s460_s0 + $0x8] sm:$0x1]  }
   0x6   :  { %s316_s7 = smov 82   ;;  %v254_v14 = vld [vmem:[%s460_s0 + $0x14] sm:$0x1]   ;;  %s317_s12 = smov 80   ;;  %v255_v15 = vld [vmem:[%s460_s0 + $0x7] sm:$0x1]  }
   0x7   :  { %s318_s13 = smov 72   ;;  %s319_s16 = smov 70   ;;  %v256_v16 = vld [vmem:[%s460_s0 + $0x13] sm:$0x1]   ;;  %v257_v17 = vld [vmem:[%s460_s0 + $0x6] sm:$0x1]  }
   0x8   :  { %s320_s21 = smov 62   ;;  %s321_s22 = smov 60   ;;  %v258_v18 = vld [vmem:[%s460_s0 + $0x1f] sm:$0x1]   ;;  %v259_v19 = vld [vmem:[%s460_s0 + $0x12] sm:$0x1]  }
   0x9   :  { %s322_s25 = smov 54   ;;  %v260_v20 = vld [vmem:[%s460_s0 + $0x5] sm:$0x1]   ;;  %s323_s30 = smov 52   ;;  %v261_v21 = vld [vmem:[%s460_s0 + $0x1e] sm:$0x1]  }
   0xa   :  { %41 = vrot.lane.b32.xlu1 %v247_v8, %s312_s24  ;;  %s324_s2 = smov 50   ;;  %s325_s5 = smov 44   ;;  %v262_v22 = vld [vmem:[%s460_s0 + $0x11] sm:$0x1]   ;;  %v263_v23 = vld [vmem:[%s460_s0 + $0x4] sm:$0x1]  }
   0xb   :  { %s326_s10 = smov 42   ;;  %s327_s11 = smov 40   ;;  %v264_v24 = vld [vmem:[%s460_s0 + $0x1d] sm:$0x1]   ;;  %v265_v25 = vld [vmem:[%s460_s0 + $0x10] sm:$0x1]  }
   0xc   :  { %25 = vrot.lane.b32.xlu0 %v24_v7, %s311_s23  ;;  %54 = vrot.lane.b32.xlu2 %v249_v9, %s313_s27  ;;  %s328_s14 = smov 34   ;;  %v266_v26 = vld [vmem:[%s460_s0 + $0x3] sm:$0x1]   ;;  %s329_s19 = smov 32   ;;  %v267_v27 = vld [vmem:[%s460_s0 + $0x1c] sm:$0x1]  }
   0xd   :  { %s330_s20 = smov 30   ;;  %s331_s23 = smov 24   ;;  %v268_v28 = vld [vmem:[%s460_s0 + $0xf] sm:$0x1]   ;;  %v269_v29 = vld [vmem:[%s460_s0 + $0x2] sm:$0x1]  }
   0xe   :  { %s332_s28 = smov 22   ;;  %s333_s29 = smov 20   ;;  %v270_v30 = vld [vmem:[%s460_s0 + $0x1b] sm:$0x1]   ;;  %v271_v31 = vld [vmem:[%s460_s0 + $0xe] sm:$0x1]  }
   0xf   :  { %v272_v32 = vld [vmem:[%s460_s0 + $0x1] sm:$0x1]   ;;  %s335_s8 = smov 12   ;;  %s336_s9 = smov 10   ;;  %v273_v33 = vld [vmem:[%s460_s0 + $0x1a] sm:$0x1]  }
  0x10   :  { %v274_v34 = vld [vmem:[%s460_s0 + $0xd] sm:$0x1]   ;;  %s338_s15 = smov 2   ;;  %v2_v35 = vld [vmem:[%s460_s0] sm:$0x1]   ;;  %vm16_vm4 = vcmask 1048528  }
  0x11   :  { %4 = vst.msk [vmem:[#allocation0] sm:$0x1] %vm3_vm2, %v2_v35   ;;  %vm27_vm5 = vcmask 15360   ;;  %vm30_vm6 = vcmask 1048512   ;;  %vm36_vm7 = vcmask 999296   ;;  %vm43_vm8 = vcmask 982896  }
  0x12   :  { %67 = vrot.lane.b32.xlu1 %v251_v11, %s315_s4  ;;  %vm49_vm9 = vcmask 917296   ;;  %vm56_vm10 = vcmask 900896   ;;  %vm114_vm11 = vcmask 523696   ;;  %vm62_vm12 = vcmask 835296  }
  0x13   :  { %vm69_vm13 = vcmask 818896   ;;  %vm75_vm14 = vcmask 753296   ;;  %vm134_vm15 = vcmask 441696   ;;  %vm82_vm0 = vcmask 736896  }
  0x14   :  { %60 = vrot.lane.b32.xlu0 %v250_v10, %s314_s3  ;;  %73 = vrot.lane.b32.xlu2 %v252_v12, %s316_s7  ;;  %s334_s3 = smov 14   ;;  %vm88_vm1 = vcmask 671296   ;;  %vm95_vm2 = vcmask 654896  }
  0x1a   :  { %86 = vrot.lane.b32.xlu1 %v254_v14, %s318_s13 }
  0x1c   :  { %80 = vrot.lane.b32.xlu0 %v253_v13, %s317_s12  ;;  %93 = vrot.lane.b32.xlu2 %v255_v15, %s319_s16  ;;  %s337_s12 = smov 4  }
  0x22   :  { %106 = vrot.lane.b32.xlu1 %v257_v17, %s321_s22 }
  0x24   :  { %99 = vrot.lane.b32.xlu0 %v256_v16, %s320_s21  ;;  %112 = vrot.lane.b32.xlu2 %v258_v18, %s322_s25 }
  0x2a   :  { %126 = vrot.lane.b32.xlu1 %v260_v20, %s324_s2 }
  0x2c   :  { %119 = vrot.lane.b32.xlu0 %v259_v19, %s323_s30  ;;  %132 = vrot.lane.b32.xlu2 %v261_v21, %s325_s5 }
  0x32   :  { %146 = vrot.lane.b32.xlu1 %v263_v23, %s327_s11 }
  0x34   :  { %139 = vrot.lane.b32.xlu0 %v262_v22, %s326_s10  ;;  %152 = vrot.lane.b32.xlu2 %v264_v24, %s328_s14 }
  0x3a   :  { %166 = vrot.lane.b32.xlu1 %v266_v26, %s330_s20 }
  0x3c   :  { %159 = vrot.lane.b32.xlu0 %v265_v25, %s329_s19  ;;  %172 = vrot.lane.b32.xlu2 %v267_v27, %s331_s23 }
  0x42   :  { %186 = vrot.lane.b32.xlu1 %v269_v29, %s333_s29 }
  0x44   :  { %179 = vrot.lane.b32.xlu0 %v268_v28, %s332_s28  ;;  %192 = vrot.lane.b32.xlu2 %v270_v30, %s334_s3 }
  0x4a   :  { %206 = vrot.lane.b32.xlu1 %v272_v32, %s336_s9 }
  0x4c   :  { %199 = vrot.lane.b32.xlu0 %v271_v31, %s335_s8  ;;  %212 = vrot.lane.b32.xlu2 %v273_v33, %s337_s12 }
  0x54   :  { %219 = vrot.lane.b32.xlu0 %v274_v34, %s338_s15 }
  0x5e   :  { %v48_v36 = vpop.permute.xlu2 %47  }
  0x66   :  { %v55_v37 = vpop.permute.xlu2 %54  }
  0x6e   :  { %v74_v38 = vpop.permute.xlu2 %73  }
  0x74   :  { %v35_v40 = vpop.permute.xlu1 %34  }
  0x76   :  { %v12_v39 = vpop.permute.xlu0 %11   ;;  %v94_v41 = vpop.permute.xlu2 %93  }
  0x77   :  { %15 = vst.msk [vmem:[#allocation0 + $0x10] sm:$0x1] %vm13_vm3, %v12_v39   ;;  %vm154_vm3 = vcmask 359696  }
  0x78   :  { %18 = vst.msk [vmem:[#allocation0 + $0x8] sm:$0x1] %vm16_vm4, %v12_v39   ;;  %vm101_vm4 = vcmask 589296  }
  0x7c   :  { %v42_v43 = vpop.permute.xlu1 %41  }
  0x7e   :  { %v26_v42 = vpop.permute.xlu0 %25   ;;  %v113_v44 = vpop.permute.xlu2 %112  }
  0x7f   :  { %29 = vst.msk [vmem:[#allocation0 + $0x8] sm:$0x1] %vm27_vm5, %v26_v42   ;;  %vm108_vm5 = vcmask 572896  }
  0x80   :  { %31 = vst.msk [vmem:[#allocation0] sm:$0x1] %vm30_vm6, %v26_v42   ;;  %vm174_vm6 = vcmask 277696  }
  0x81   :  { %38 = vst.msk [vmem:[#allocation0 + $0x8] sm:$0x1] %vm36_vm7, %v35_v40   ;;  %vm121_vm7 = vcmask 507296  }
  0x82   :  { %44 = vst.msk [vmem:[#allocation0] sm:$0x1] %vm43_vm8, %v42_v43   ;;  %vm128_vm8 = vcmask 490896  }
  0x83   :  { %51 = vst.msk [vmem:[#allocation0 + $0x8] sm:$0x1] %vm49_vm9, %v48_v36   ;;  %vm194_vm9 = vcmask 195696  }
  0x84   :  { %57 = vst.msk [vmem:[#allocation0] sm:$0x1] %vm56_vm10, %v55_v37   ;;  %v68_v46 = vpop.permute.xlu1 %67   ;;  %vm141_vm10 = vcmask 425296  }
  0x85   :  { %116 = vst.msk [vmem:[#allocation0 + $0x10] sm:$0x1] %vm114_vm11, %v113_v44   ;;  %vm148_vm11 = vcmask 408896  }
  0x86   :  { %v61_v45 = vpop.permute.xlu0 %60   ;;  %70 = vst.msk [vmem:[#allocation0] sm:$0x1] %vm69_vm13, %v68_v46   ;;  %v133_v47 = vpop.permute.xlu2 %132   ;;  %vm161_vm13 = vcmask 343296  }
  0x87   :  { %64 = vst.msk [vmem:[#allocation0 + $0x8] sm:$0x1] %vm62_vm12, %v61_v45   ;;  %vm214_vm12 = vcmask 113696  }
  0x88   :  { %77 = vst.msk [vmem:[#allocation0 + $0x8] sm:$0x1] %vm75_vm14, %v74_v38   ;;  %vm168_vm14 = vcmask 326896  }
  0x89   :  { %136 = vst.msk [vmem:[#allocation0 + $0x10] sm:$0x1] %vm134_vm15, %v133_v47   ;;  %vm181_vm15 = vcmask 261296  }
  0x8c   :  { %v87_v49 = vpop.permute.xlu1 %86  }
  0x8d   :  { %90 = vst.msk [vmem:[#allocation0 + $0x8] sm:$0x1] %vm88_vm1, %v87_v49   ;;  %vm201_vm1 = vcmask 179296  }
  0x8e   :  { %v81_v48 = vpop.permute.xlu0 %80   ;;  %v153_v50 = vpop.permute.xlu2 %152  }
  0x8f   :  { %83 = vst.msk [vmem:[#allocation0] sm:$0x1] %vm82_vm0, %v81_v48   ;;  %vm188_vm0 = vcmask 244896  }
  0x90   :  { %96 = vst.msk [vmem:[#allocation0] sm:$0x1] %vm95_vm2, %v94_v41   ;;  %vm208_vm2 = vcmask 162896  }
  0x91   :  { %156 = vst.msk [vmem:[#allocation0 + $0x10] sm:$0x1] %vm154_vm3, %v153_v50   ;;  %vm221_vm3 = vcmask 97296  }
  0x94   :  { %v107_v52 = vpop.permute.xlu1 %106  }
  0x95   :  { %109 = vst.msk [vmem:[#allocation0] sm:$0x1] %vm108_vm5, %v107_v52  }
  0x96   :  { %v100_v51 = vpop.permute.xlu0 %99   ;;  %v173_v53 = vpop.permute.xlu2 %172  }
  0x97   :  { %103 = vst.msk [vmem:[#allocation0 + $0x8] sm:$0x1] %vm101_vm4, %v100_v51  }
  0x98   :  { %176 = vst.msk [vmem:[#allocation0 + $0x10] sm:$0x1] %vm174_vm6, %v173_v53  }
  0x9c   :  { %v127_v55 = vpop.permute.xlu1 %126  }
  0x9d   :  { %129 = vst.msk [vmem:[#allocation0] sm:$0x1] %vm128_vm8, %v127_v55  }
  0x9e   :  { %v120_v54 = vpop.permute.xlu0 %119   ;;  %v193_v56 = vpop.permute.xlu2 %192  }
  0x9f   :  { %123 = vst.msk [vmem:[#allocation0 + $0x8] sm:$0x1] %vm121_vm7, %v120_v54  }
  0xa0   :  { %196 = vst.msk [vmem:[#allocation0 + $0x10] sm:$0x1] %vm194_vm9, %v193_v56  }
  0xa4   :  { %v147_v58 = vpop.permute.xlu1 %146  }
  0xa5   :  { %149 = vst.msk [vmem:[#allocation0] sm:$0x1] %vm148_vm11, %v147_v58  }
  0xa6   :  { %v140_v57 = vpop.permute.xlu0 %139   ;;  %v213_v59 = vpop.permute.xlu2 %212  }
  0xa7   :  { %143 = vst.msk [vmem:[#allocation0 + $0x8] sm:$0x1] %vm141_vm10, %v140_v57  }
  0xa8   :  { %216 = vst.msk [vmem:[#allocation0 + $0x10] sm:$0x1] %vm214_vm12, %v213_v59  }
  0xac   :  { %v167_v61 = vpop.permute.xlu1 %166  }
  0xad   :  { %169 = vst.msk [vmem:[#allocation0] sm:$0x1] %vm168_vm14, %v167_v61  }
  0xae   :  { %v160_v60 = vpop.permute.xlu0 %159  }
  0xaf   :  { %163 = vst.msk [vmem:[#allocation0 + $0x8] sm:$0x1] %vm161_vm13, %v160_v60   ;;  %v237_v62 = vld [vmem:[#allocation0 + $0x10] sm:$0x1] }
  0xb0   :  { %276 = vst [vmem:[%s461_s1 + $0x2] sm:$0x1] %v237_v62 }
  0xb4   :  { %v187_v0 = vpop.permute.xlu1 %186  }
  0xb5   :  { %189 = vst.msk [vmem:[#allocation0] sm:$0x1] %vm188_vm0, %v187_v0  }
  0xb6   :  { %v180_v63 = vpop.permute.xlu0 %179  }
  0xb7   :  { %183 = vst.msk [vmem:[#allocation0 + $0x8] sm:$0x1] %vm181_vm15, %v180_v63  }
  0xbc   :  { %v207_v2 = vpop.permute.xlu1 %206  }
  0xbd   :  { %209 = vst.msk [vmem:[#allocation0] sm:$0x1] %vm208_vm2, %v207_v2  }
  0xbe   :  { %v200_v1 = vpop.permute.xlu0 %199  }
  0xbf   :  { %203 = vst.msk [vmem:[#allocation0 + $0x8] sm:$0x1] %vm201_vm1, %v200_v1  }
  0xc4   :  { %v226_v4 = vld [vmem:[#allocation0] sm:$0x1] }
  0xc5   :  { %229 = vst [vmem:[%s461_s1] sm:$0x1] %v226_v4 }
  0xc6   :  { %v220_v3 = vpop.permute.xlu0 %219  }
  0xc7   :  { %223 = vst.msk [vmem:[#allocation0 + $0x8] sm:$0x1] %vm221_vm3, %v220_v3  }
  0xce   :  { %v231_v5 = vld [vmem:[#allocation0 + $0x8] sm:$0x1] }
  0xcf   :  { %275 = vst [vmem:[%s461_s1 + $0x1] sm:$0x1] %v231_v5 }

// kernel: tile.18
= control target key start
LH: loop header
LB: loop body
LE: loop exit
PB: predicated region body
PF: predicated region fallthrough
CT: control target
= control target key end

     0   :  { %s40_s0 = inlined_call_operand.vmem [shape: f32[3], index: 0, kind: input, shape index: {}]   ;;  %s41_s1 = inlined_call_operand.vmem [shape: f32[32,3], index: 1, kind: output, shape index: {}]  }
   0x1   :  { %v4_v0 = vld [vmem:[%s40_s0] ss:$0 sm:$0xff] }
   0x2   :  { %5 = vst [vmem:[%s41_s1] sm:$0xff] %v4_v0 }
   0x3   :  { %12 = vst [vmem:[%s41_s1 + $0x8] sm:$0xff] %v4_v0 }
   0x4   :  { %13 = vst [vmem:[%s41_s1 + $0x10] sm:$0xff] %v4_v0 }
   0x5   :  { %14 = vst [vmem:[%s41_s1 + $0x18] sm:$0xff] %v4_v0 }

// kernel: tile.19
= control target key start
LH: loop header
LB: loop body
LE: loop exit
PB: predicated region body
PF: predicated region fallthrough
CT: control target
= control target key end

     0   :  { %s259_s10 = smov 93   ;;  %s260_s11 = smov 87   ;;  %vm3_vm0 = vcmask 23552   ;;  %vm9_vm1 = vcmask 786152   ;;  %vm15_vm2 = vcmask 761552   ;;  %vm21_vm3 = vcmask 736952   ;;  %s399_s0 = inlined_call_operand.vmem [shape: f32[32,3], index: 0, kind: input, shape index: {}]   ;;  %s400_s1 = inlined_call_operand.vmem [shape: f32[1,96], index: 1, kind: output, shape index: {}]  }
   0x1   :  { %v197_v0 = vld [vmem:[%s399_s0 + $0x1f] sm:$0x1]   ;;  %v199_v1 = vld [vmem:[%s399_s0 + $0x1d] sm:$0x1]   ;;  %v201_v2 = vld [vmem:[%s399_s0 + $0x1b] sm:$0x1]  }
   0x2   :  { %7 = vrot.lane.b32.xlu0 %v197_v0, %s259_s10  ;;  %19 = vrot.lane.b32.xlu1 %v199_v1, %s260_s11  ;;  %s261_s14 = smov 81   ;;  %v198_v3 = vld [vmem:[%s399_s0 + $0x1e] sm:$0x1]   ;;  %v200_v4 = vld [vmem:[%s399_s0 + $0x1c] sm:$0x1]   ;;  %s262_s19 = smov 90  }
   0x3   :  { %31 = vrot.lane.b32.xlu2 %v201_v2, %s261_s14  ;;  %s263_s20 = smov 84   ;;  %v202_v5 = vld [vmem:[%s399_s0 + $0x1a] sm:$0x1]   ;;  %s264_s23 = smov 78   ;;  %v203_v6 = vld [vmem:[%s399_s0 + $0x19] sm:$0x1]  }
   0x4   :  { %v204_v7 = vld [vmem:[%s399_s0 + $0x18] sm:$0x1]   ;;  %s265_s28 = smov 75   ;;  %s266_s29 = smov 72   ;;  %v205_v8 = vld [vmem:[%s399_s0 + $0x17] sm:$0x1]  }
   0x5   :  { %s267_s3 = smov 69   ;;  %v206_v9 = vld [vmem:[%s399_s0 + $0x16] sm:$0x1]   ;;  %v207_v10 = vld [vmem:[%s399_s0 + $0x15] sm:$0x1]   ;;  %s268_s8 = smov 66  }
   0x6   :  { %s269_s9 = smov 63   ;;  %v208_v11 = vld [vmem:[%s399_s0 + $0x14] sm:$0x1]   ;;  %s270_s12 = smov 60   ;;  %v209_v12 = vld [vmem:[%s399_s0 + $0x13] sm:$0x1]  }
   0x7   :  { %v210_v13 = vld [vmem:[%s399_s0 + $0x12] sm:$0x1]   ;;  %s271_s17 = smov 57   ;;  %s272_s18 = smov 54   ;;  %v211_v14 = vld [vmem:[%s399_s0 + $0x11] sm:$0x1]  }
   0x8   :  { %s273_s21 = smov 51   ;;  %v212_v15 = vld [vmem:[%s399_s0 + $0x10] sm:$0x1]   ;;  %v213_v16 = vld [vmem:[%s399_s0 + $0xf] sm:$0x1]   ;;  %s274_s26 = smov 48  }
   0x9   :  { %s275_s27 = smov 45   ;;  %v214_v17 = vld [vmem:[%s399_s0 + $0xe] sm:$0x1]   ;;  %s276_s30 = smov 42   ;;  %v215_v18 = vld [vmem:[%s399_s0 + $0xd] sm:$0x1]  }
   0xa   :  { %13 = vrot.lane.b32.xlu0 %v198_v3, %s262_s19  ;;  %25 = vrot.lane.b32.xlu1 %v200_v4, %s263_s20  ;;  %v216_v19 = vld [vmem:[%s399_s0 + $0xc] sm:$0x1]   ;;  %s277_s6 = smov 39   ;;  %s278_s7 = smov 36   ;;  %v217_v20 = vld [vmem:[%s399_s0 + $0xb] sm:$0x1]  }
   0xb   :  { %37 = vrot.lane.b32.xlu2 %v202_v5, %s264_s23  ;;  %s279_s10 = smov 33   ;;  %v218_v21 = vld [vmem:[%s399_s0 + $0xa] sm:$0x1]   ;;  %v219_v22 = vld [vmem:[%s399_s0 + $0x9] sm:$0x1]   ;;  %s280_s15 = smov 30  }
   0xc   :  { %s281_s16 = smov 27   ;;  %v220_v23 = vld [vmem:[%s399_s0 + $0x8] sm:$0x1]   ;;  %s282_s19 = smov 24   ;;  %v221_v24 = vld [vmem:[%s399_s0 + $0x7] sm:$0x1]  }
   0xd   :  { %v222_v25 = vld [vmem:[%s399_s0 + $0x6] sm:$0x1]   ;;  %s283_s24 = smov 21   ;;  %s284_s25 = smov 18   ;;  %v223_v26 = vld [vmem:[%s399_s0 + $0x5] sm:$0x1]  }
   0xe   :  { %v224_v27 = vld [vmem:[%s399_s0 + $0x4] sm:$0x1]   ;;  %v225_v28 = vld [vmem:[%s399_s0 + $0x3] sm:$0x1]   ;;  %s286_s4 = smov 12   ;;  %s287_s5 = smov 9  }
   0xf   :  { %v226_v29 = vld [vmem:[%s399_s0 + $0x2] sm:$0x1]   ;;  %v227_v30 = vld [vmem:[%s399_s0 + $0x1] sm:$0x1]   ;;  %s289_s11 = smov 3   ;;  %vm27_vm4 = vcmask 712352  }
  0x10   :  { %v2_v31 = vld [vmem:[%s399_s0] sm:$0x1]   ;;  %vm33_vm5 = vcmask 687752   ;;  %vm39_vm6 = vcmask 663152   ;;  %vm45_vm7 = vcmask 638552   ;;  %vm51_vm8 = vcmask 613952  }
  0x11   :  { %4 = vst.msk [vmem:[#allocation0] sm:$0x1] %vm3_vm0, %v2_v31   ;;  %vm57_vm9 = vcmask 589352   ;;  %vm63_vm10 = vcmask 564752   ;;  %vm69_vm11 = vcmask 540152   ;;  %vm75_vm12 = vcmask 515552  }
  0x12   :  { %43 = vrot.lane.b32.xlu0 %v203_v6, %s265_s28  ;;  %49 = vrot.lane.b32.xlu1 %v204_v7, %s266_s29  ;;  %s285_s28 = smov 15   ;;  %vm81_vm13 = vcmask 490952   ;;  %vm87_vm14 = vcmask 466352   ;;  %vm93_vm15 = vcmask 441752   ;;  %vm99_vm0 = vcmask 417152  }
  0x13   :  { %55 = vrot.lane.b32.xlu2 %v205_v8, %s267_s3 }
  0x1a   :  { %61 = vrot.lane.b32.xlu0 %v206_v9, %s268_s8  ;;  %67 = vrot.lane.b32.xlu1 %v207_v10, %s269_s9  ;;  %s288_s8 = smov 6  }
  0x1b   :  { %73 = vrot.lane.b32.xlu2 %v208_v11, %s270_s12 }
  0x22   :  { %79 = vrot.lane.b32.xlu0 %v209_v12, %s271_s17  ;;  %85 = vrot.lane.b32.xlu1 %v210_v13, %s272_s18 }
  0x23   :  { %91 = vrot.lane.b32.xlu2 %v211_v14, %s273_s21 }
  0x2a   :  { %97 = vrot.lane.b32.xlu0 %v212_v15, %s274_s26  ;;  %103 = vrot.lane.b32.xlu1 %v213_v16, %s275_s27 }
  0x2b   :  { %109 = vrot.lane.b32.xlu2 %v214_v17, %s276_s30 }
  0x32   :  { %115 = vrot.lane.b32.xlu0 %v215_v18, %s277_s6  ;;  %121 = vrot.lane.b32.xlu1 %v216_v19, %s278_s7 }
  0x33   :  { %127 = vrot.lane.b32.xlu2 %v217_v20, %s279_s10 }
  0x3a   :  { %133 = vrot.lane.b32.xlu0 %v218_v21, %s280_s15  ;;  %139 = vrot.lane.b32.xlu1 %v219_v22, %s281_s16 }
  0x3b   :  { %145 = vrot.lane.b32.xlu2 %v220_v23, %s282_s19 }
  0x42   :  { %151 = vrot.lane.b32.xlu0 %v221_v24, %s283_s24  ;;  %157 = vrot.lane.b32.xlu1 %v222_v25, %s284_s25 }
  0x43   :  { %163 = vrot.lane.b32.xlu2 %v223_v26, %s285_s28 }
  0x4a   :  { %169 = vrot.lane.b32.xlu0 %v224_v27, %s286_s4  ;;  %175 = vrot.lane.b32.xlu1 %v225_v28, %s287_s5 }
  0x4b   :  { %181 = vrot.lane.b32.xlu2 %v226_v29, %s288_s8 }
  0x52   :  { %187 = vrot.lane.b32.xlu0 %v227_v30, %s289_s11 }
  0x5d   :  { %v32_v32 = vpop.permute.xlu2 %31  }
  0x65   :  { %v38_v33 = vpop.permute.xlu2 %37  }
  0x6d   :  { %v56_v34 = vpop.permute.xlu2 %55  }
  0x74   :  { %v8_v35 = vpop.permute.xlu0 %7   ;;  %v20_v36 = vpop.permute.xlu1 %19  }
  0x75   :  { %10 = vst.msk [vmem:[#allocation0] sm:$0x1] %vm9_vm1, %v8_v35   ;;  %v74_v37 = vpop.permute.xlu2 %73   ;;  %vm105_vm1 = vcmask 392552  }
  0x7c   :  { %v14_v38 = vpop.permute.xlu0 %13   ;;  %v26_v39 = vpop.permute.xlu1 %25  }
  0x7d   :  { %16 = vst.msk [vmem:[#allocation0] sm:$0x1] %vm15_vm2, %v14_v38   ;;  %v92_v40 = vpop.permute.xlu2 %91   ;;  %vm111_vm2 = vcmask 367952  }
  0x7e   :  { %22 = vst.msk [vmem:[#allocation0] sm:$0x1] %vm21_vm3, %v20_v36   ;;  %vm117_vm3 = vcmask 343352  }
  0x7f   :  { %28 = vst.msk [vmem:[#allocation0] sm:$0x1] %vm27_vm4, %v26_v39   ;;  %vm123_vm4 = vcmask 318752  }
  0x80   :  { %34 = vst.msk [vmem:[#allocation0] sm:$0x1] %vm33_vm5, %v32_v32   ;;  %vm129_vm5 = vcmask 294152  }
  0x81   :  { %40 = vst.msk [vmem:[#allocation0] sm:$0x1] %vm39_vm6, %v38_v33   ;;  %vm135_vm6 = vcmask 269552  }
  0x84   :  { %v44_v41 = vpop.permute.xlu0 %43   ;;  %v50_v42 = vpop.permute.xlu1 %49  }
  0x85   :  { %46 = vst.msk [vmem:[#allocation0] sm:$0x1] %vm45_vm7, %v44_v41   ;;  %v110_v43 = vpop.permute.xlu2 %109   ;;  %vm141_vm7 = vcmask 244952  }
  0x86   :  { %52 = vst.msk [vmem:[#allocation0] sm:$0x1] %vm51_vm8, %v50_v42   ;;  %vm147_vm8 = vcmask 220352  }
  0x87   :  { %58 = vst.msk [vmem:[#allocation0] sm:$0x1] %vm57_vm9, %v56_v34   ;;  %vm153_vm9 = vcmask 195752  }
  0x8c   :  { %v62_v44 = vpop.permute.xlu0 %61   ;;  %v68_v45 = vpop.permute.xlu1 %67  }
  0x8d   :  { %64 = vst.msk [vmem:[#allocation0] sm:$0x1] %vm63_vm10, %v62_v44   ;;  %v128_v46 = vpop.permute.xlu2 %127   ;;  %vm159_vm10 = vcmask 171152  }
  0x8e   :  { %70 = vst.msk [vmem:[#allocation0] sm:$0x1] %vm69_vm11, %v68_v45   ;;  %vm165_vm11 = vcmask 146552  }
  0x8f   :  { %76 = vst.msk [vmem:[#allocation0] sm:$0x1] %vm75_vm12, %v74_v37   ;;  %vm171_vm12 = vcmask 121952  }
  0x94   :  { %v80_v47 = vpop.permute.xlu0 %79   ;;  %v86_v48 = vpop.permute.xlu1 %85  }
  0x95   :  { %82 = vst.msk [vmem:[#allocation0] sm:$0x1] %vm81_vm13, %v80_v47   ;;  %v146_v49 = vpop.permute.xlu2 %145   ;;  %vm177_vm13 = vcmask 97352  }
  0x96   :  { %88 = vst.msk [vmem:[#allocation0] sm:$0x1] %vm87_vm14, %v86_v48   ;;  %vm183_vm14 = vcmask 72752  }
  0x97   :  { %94 = vst.msk [vmem:[#allocation0] sm:$0x1] %vm93_vm15, %v92_v40   ;;  %vm189_vm15 = vcmask 48152  }
  0x9c   :  { %v98_v50 = vpop.permute.xlu0 %97   ;;  %v104_v51 = vpop.permute.xlu1 %103  }
  0x9d   :  { %100 = vst.msk [vmem:[#allocation0] sm:$0x1] %vm99_vm0, %v98_v50   ;;  %v164_v52 = vpop.permute.xlu2 %163  }
  0x9e   :  { %106 = vst.msk [vmem:[#allocation0] sm:$0x1] %vm105_vm1, %v104_v51  }
  0x9f   :  { %112 = vst.msk [vmem:[#allocation0] sm:$0x1] %vm111_vm2, %v110_v43  }
  0xa4   :  { %v116_v53 = vpop.permute.xlu0 %115   ;;  %v122_v54 = vpop.permute.xlu1 %121  }
  0xa5   :  { %118 = vst.msk [vmem:[#allocation0] sm:$0x1] %vm117_vm3, %v116_v53   ;;  %v182_v55 = vpop.permute.xlu2 %181  }
  0xa6   :  { %124 = vst.msk [vmem:[#allocation0] sm:$0x1] %vm123_vm4, %v122_v54  }
  0xa7   :  { %130 = vst.msk [vmem:[#allocation0] sm:$0x1] %vm129_vm5, %v128_v46  }
  0xac   :  { %v134_v56 = vpop.permute.xlu0 %133   ;;  %v140_v57 = vpop.permute.xlu1 %139  }
  0xad   :  { %136 = vst.msk [vmem:[#allocation0] sm:$0x1] %vm135_vm6, %v134_v56  }
  0xae   :  { %142 = vst.msk [vmem:[#allocation0] sm:$0x1] %vm141_vm7, %v140_v57  }
  0xaf   :  { %148 = vst.msk [vmem:[#allocation0] sm:$0x1] %vm147_vm8, %v146_v49  }
  0xb4   :  { %v152_v58 = vpop.permute.xlu0 %151   ;;  %v158_v59 = vpop.permute.xlu1 %157  }
  0xb5   :  { %154 = vst.msk [vmem:[#allocation0] sm:$0x1] %vm153_vm9, %v152_v58  }
  0xb6   :  { %160 = vst.msk [vmem:[#allocation0] sm:$0x1] %vm159_vm10, %v158_v59  }
  0xb7   :  { %166 = vst.msk [vmem:[#allocation0] sm:$0x1] %vm165_vm11, %v164_v52  }
  0xbc   :  { %v170_v60 = vpop.permute.xlu0 %169   ;;  %v176_v61 = vpop.permute.xlu1 %175  }
  0xbd   :  { %172 = vst.msk [vmem:[#allocation0] sm:$0x1] %vm171_vm12, %v170_v60  }
  0xbe   :  { %178 = vst.msk [vmem:[#allocation0] sm:$0x1] %vm177_vm13, %v176_v61  }
  0xbf   :  { %184 = vst.msk [vmem:[#allocation0] sm:$0x1] %vm183_vm14, %v182_v55  }
  0xc4   :  { %v188_v62 = vpop.permute.xlu0 %187  }
  0xc5   :  { %190 = vst.msk [vmem:[#allocation0] sm:$0x1] %vm189_vm15, %v188_v62  }
  0xcc   :  { %v193_v63 = vld [vmem:[#allocation0] sm:$0x1] }
  0xcd   :  { %196 = vst [vmem:[%s400_s1] sm:$0x1] %v193_v63 }

// kernel: iris_forward.1
= control target key start
LH: loop header
LB: loop body
LE: loop exit
PB: predicated region body
PF: predicated region fallthrough
CT: control target
= control target key end

     0   :  { %vm181_vm0 = vcmask 523264   ;;  %vm245_vm1 = vcmask 778240   ;;  %s558_s1 = inlined_call_operand.vmem [shape: f32[128,320], index: 1, kind: input, shape index: {}]   ;;  %s559_s3 = inlined_call_operand.vmem [shape: f32[320,96], index: 3, kind: input, shape index: {}]   ;;  %s560_s0 = inlined_call_operand.vmem [shape: f32[1,128], index: 0, kind: input, shape index: {}]   ;;  %s561_s2 = inlined_call_operand.vmem [shape: f32[1,320], index: 2, kind: input, shape index: {}]   ;;  %s562_s4 = inlined_call_operand.vmem [shape: f32[1,96], index: 4, kind: input, shape index: {}]   ;;  %s563_s5 = inlined_call_operand.vmem [shape: f32[1,96], index: 5, kind: output, shape index: {}]  }
   0x1   :  { %v66_v0 = vld [vmem:[%s558_s1 + $0x168] sm:$0xff]  ;;  %v63_v1 = vld [vmem:[%s558_s1 + $0x150] sm:$0xff]  ;;  %v68_v2 = vld [vmem:[%s558_s1 + $0x178] sm:$0xff] }
   0x2   :  { %77 = vmatpush.msra.mxu0 %v66_v0  ;;  %v65_v3 = vld [vmem:[%s558_s1 + $0x160] sm:$0xff]  ;;  %v60_v4 = vld [vmem:[%s558_s1 + $0x138] sm:$0xff]  ;;  %117 = vmatpush.msra.mxu2 %v68_v2  ;;  %v67_v5 = vld [vmem:[%s558_s1 + $0x170] sm:$0xff] }
   0x3   :  { %97 = vmatpush.msra.mxu1 %v67_v5  ;;  %v62_v6 = vld [vmem:[%s558_s1 + $0x148] sm:$0xff]  ;;  %v64_v7 = vld [vmem:[%s558_s1 + $0x158] sm:$0xff]  ;;  %v57_v8 = vld [vmem:[%s558_s1 + $0x120] sm:$0xff] }
   0x4   :  { %78 = vmatpush.msra.mxu0 %v63_v1  ;;  %118 = vmatpush.msra.mxu2 %v65_v3  ;;  %v61_v9 = vld [vmem:[%s558_s1 + $0x140] sm:$0xff]  ;;  %v59_v10 = vld [vmem:[%s558_s1 + $0x130] sm:$0xff]  ;;  %v54_v11 = vld [vmem:[%s558_s1 + $0x108] sm:$0xff] }
   0x5   :  { %98 = vmatpush.msra.mxu1 %v64_v7  ;;  %v58_v12 = vld [vmem:[%s558_s1 + $0x128] sm:$0xff]  ;;  %v56_v13 = vld [vmem:[%s558_s1 + $0x118] sm:$0xff]  ;;  %v51_v14 = vld [vmem:[%s558_s1 + $0xf0] sm:$0xff] }
   0x6   :  { %79 = vmatpush.msra.mxu0 %v60_v4  ;;  %119 = vmatpush.msra.mxu2 %v62_v6  ;;  %v55_v15 = vld [vmem:[%s558_s1 + $0x110] sm:$0xff]  ;;  %v53_v16 = vld [vmem:[%s558_s1 + $0x100] sm:$0xff]  ;;  %v48_v17 = vld [vmem:[%s558_s1 + $0xd8] sm:$0xff] }
   0x7   :  { %99 = vmatpush.msra.mxu1 %v61_v9  ;;  %v52_v18 = vld [vmem:[%s558_s1 + $0xf8] sm:$0xff]  ;;  %v50_v19 = vld [vmem:[%s558_s1 + $0xe8] sm:$0xff]  ;;  %v45_v20 = vld [vmem:[%s558_s1 + $0xc0] sm:$0xff] }
   0x8   :  { %80 = vmatpush.msra.mxu0 %v57_v8  ;;  %120 = vmatpush.msra.mxu2 %v59_v10  ;;  %v49_v21 = vld [vmem:[%s558_s1 + $0xe0] sm:$0xff]  ;;  %v47_v22 = vld [vmem:[%s558_s1 + $0xd0] sm:$0xff]  ;;  %v42_v23 = vld [vmem:[%s558_s1 + $0xa8] sm:$0xff] }
   0x9   :  { %100 = vmatpush.msra.mxu1 %v58_v12  ;;  %v46_v24 = vld [vmem:[%s558_s1 + $0xc8] sm:$0xff]  ;;  %v44_v25 = vld [vmem:[%s558_s1 + $0xb8] sm:$0xff]  ;;  %v39_v26 = vld [vmem:[%s558_s1 + $0x90] sm:$0xff] }
   0xa   :  { %81 = vmatpush.msra.mxu0 %v54_v11  ;;  %121 = vmatpush.msra.mxu2 %v56_v13  ;;  %v43_v27 = vld [vmem:[%s558_s1 + $0xb0] sm:$0xff]  ;;  %v155_v28 = vld [vmem:[%s559_s3 + $0x78] sm:$0xff]  ;;  %v41_v29 = vld [vmem:[%s558_s1 + $0xa0] sm:$0xff] }
   0xb   :  { %101 = vmatpush.msra.mxu1 %v55_v15  ;;  %v154_v30 = vld [vmem:[%s559_s3 + $0x70] sm:$0xff]  ;;  %v36_v31 = vld [vmem:[%s558_s1 + $0x78] sm:$0xff]  ;;  %185 = vmatpush.msra.mxu3 %v155_v28  ;;  %v38_v33 = vld [vmem:[%s558_s1 + $0x88] sm:$0xff] }
   0xc   :  { %82 = vmatpush.msra.mxu0 %v51_v14  ;;  %122 = vmatpush.msra.mxu2 %v53_v16  ;;  %v40_v32 = vld [vmem:[%s558_s1 + $0x98] sm:$0xff]  ;;  %v153_v34 = vld [vmem:[%s559_s3 + $0x68] sm:$0xff]  ;;  %v33_v35 = vld [vmem:[%s558_s1 + $0x60] sm:$0xff] }
   0xd   :  { %102 = vmatpush.msra.mxu1 %v52_v18  ;;  %v37_v36 = vld [vmem:[%s558_s1 + $0x80] sm:$0xff]  ;;  %186 = vmatpush.msra.mxu3 %v154_v30  ;;  %v35_v37 = vld [vmem:[%s558_s1 + $0x70] sm:$0xff]  ;;  %v30_v39 = vld [vmem:[%s558_s1 + $0x48] sm:$0xff] }
   0xe   :  { %83 = vmatpush.msra.mxu0 %v48_v17  ;;  %123 = vmatpush.msra.mxu2 %v50_v19  ;;  %v152_v38 = vld [vmem:[%s559_s3 + $0x60] sm:$0xff]  ;;  %v34_v40 = vld [vmem:[%s558_s1 + $0x68] sm:$0xff]  ;;  %v32_v41 = vld [vmem:[%s558_s1 + $0x58] sm:$0xff] }
   0xf   :  { %103 = vmatpush.msra.mxu1 %v49_v21  ;;  %187 = vmatpush.msra.mxu3 %v153_v34  ;;  %v151_v42 = vld [vmem:[%s559_s3 + $0x58] sm:$0xff]  ;;  %v27_v43 = vld [vmem:[%s558_s1 + $0x30] sm:$0xff]  ;;  %v29_v45 = vld [vmem:[%s558_s1 + $0x40] sm:$0xff] }
  0x10   :  { %84 = vmatpush.msra.mxu0 %v45_v20  ;;  %124 = vmatpush.msra.mxu2 %v47_v22  ;;  %v31_v44 = vld [vmem:[%s558_s1 + $0x50] sm:$0xff]  ;;  %v24_v47 = vld [vmem:[%s558_s1 + $0x18] sm:$0xff]  ;;  %v26_v49 = vld [vmem:[%s558_s1 + $0x28] sm:$0xff] }
  0x11   :  { %104 = vmatpush.msra.mxu1 %v46_v24  ;;  %188 = vmatpush.msra.mxu3 %v152_v38  ;;  %v150_v46 = vld [vmem:[%s559_s3 + $0x50] sm:$0xff]  ;;  %v28_v48 = vld [vmem:[%s558_s1 + $0x38] sm:$0xff]  ;;  %v149_v50 = vld [vmem:[%s559_s3 + $0x48] sm:$0xff] }
  0x12   :  { %85 = vmatpush.msra.mxu0 %v42_v23  ;;  %125 = vmatpush.msra.mxu2 %v44_v25  ;;  %v21_v51 = vld [vmem:[%s558_s1] sm:$0xff]  ;;  %v23_v54 = vld [vmem:[%s558_s1 + $0x10] sm:$0xff]  ;;  %v22_v55 = vld [vmem:[%s558_s1 + $0x8] sm:$0xff] }
  0x13   :  { %105 = vmatpush.msra.mxu1 %v43_v27  ;;  %189 = vmatpush.msra.mxu3 %v151_v42  ;;  %v25_v52 = vld [vmem:[%s558_s1 + $0x20] sm:$0xff]  ;;  %v171_v56 = vld [vmem:[%s559_s3 + $0xf8] sm:$0xff]  ;;  %v170_v58 = vld [vmem:[%s559_s3 + $0xf0] sm:$0xff] }
  0x14   :  { %86 = vmatpush.msra.mxu0 %v39_v26  ;;  %126 = vmatpush.msra.mxu2 %v41_v29  ;;  %v20_v53 = vld [vmem:[%s560_s0] sm:$0x1]  ;;  %v147_v59 = vld [vmem:[%s559_s3 + $0x38] sm:$0xff]  ;;  %v169_v60 = vld [vmem:[%s559_s3 + $0xe8] sm:$0xff] }
  0x15   :  { %106 = vmatpush.msra.mxu1 %v40_v32  ;;  %190 = vmatpush.msra.mxu3 %v150_v46  ;;  %v148_v57 = vld [vmem:[%s559_s3 + $0x40] sm:$0xff]  ;;  %v146_v61 = vld [vmem:[%s559_s3 + $0x30] sm:$0xff]  ;;  %v145_v63 = vld [vmem:[%s559_s3 + $0x28] sm:$0xff] }
  0x16   :  { %87 = vmatpush.msra.mxu0 %v36_v31  ;;  %127 = vmatpush.msra.mxu2 %v38_v33  ;;  %v168_v62 = vld [vmem:[%s559_s3 + $0xe0] sm:$0xff]  ;;  %v167_v0 = vld [vmem:[%s559_s3 + $0xd8] sm:$0xff]  ;;  %v166_v2 = vld [vmem:[%s559_s3 + $0xd0] sm:$0xff] }
  0x17   :  { %107 = vmatpush.msra.mxu1 %v37_v36  ;;  %191 = vmatpush.msra.mxu3 %v149_v50  ;;  %v144_v1 = vld [vmem:[%s559_s3 + $0x20] sm:$0xff]  ;;  %v143_v3 = vld [vmem:[%s559_s3 + $0x18] sm:$0xff]  ;;  %v165_v4 = vld [vmem:[%s559_s3 + $0xc8] sm:$0xff] }
  0x18   :  { %88 = vmatpush.msra.mxu0 %v33_v35  ;;  %128 = vmatpush.msra.mxu2 %v35_v37  ;;  %v164_v5 = vld [vmem:[%s559_s3 + $0xc0] sm:$0xff]  ;;  %v163_v6 = vld [vmem:[%s559_s3 + $0xb8] sm:$0xff]  ;;  %v142_v7 = vld [vmem:[%s559_s3 + $0x10] sm:$0xff] }
  0x19   :  { %108 = vmatpush.msra.mxu1 %v34_v40  ;;  %192 = vmatpush.msra.mxu3 %v148_v57  ;;  %v162_v8 = vld [vmem:[%s559_s3 + $0xb0] sm:$0xff]  ;;  %v179_v9 = vld [vmem:[%s559_s3 + $0x138] sm:$0xff]  ;;  %v141_v10 = vld [vmem:[%s559_s3 + $0x8] sm:$0xff] }
  0x1a   :  { %89 = vmatpush.msra.mxu0 %v30_v39  ;;  %129 = vmatpush.msra.mxu2 %v32_v41  ;;  %v161_v11 = vld [vmem:[%s559_s3 + $0xa8] sm:$0xff]  ;;  %v178_v12 = vld [vmem:[%s559_s3 + $0x130] sm:$0xff]  ;;  %v140_v13 = vld [vmem:[%s559_s3] sm:$0xff] }
  0x1b   :  { %109 = vmatpush.msra.mxu1 %v31_v44  ;;  %193 = vmatpush.msra.mxu3 %v147_v59  ;;  %v160_v14 = vld [vmem:[%s559_s3 + $0xa0] sm:$0xff]  ;;  %v177_v15 = vld [vmem:[%s559_s3 + $0x128] sm:$0xff]  ;;  %v159_v16 = vld [vmem:[%s559_s3 + $0x98] sm:$0xff] }
  0x1c   :  { %90 = vmatpush.msra.mxu0 %v27_v43  ;;  %130 = vmatpush.msra.mxu2 %v29_v45  ;;  %v176_v17 = vld [vmem:[%s559_s3 + $0x120] sm:$0xff]  ;;  %v158_v18 = vld [vmem:[%s559_s3 + $0x90] sm:$0xff]  ;;  %v175_v19 = vld [vmem:[%s559_s3 + $0x118] sm:$0xff] }
  0x1d   :  { %110 = vmatpush.msra.mxu1 %v28_v48  ;;  %194 = vmatpush.msra.mxu3 %v146_v61  ;;  %v157_v20 = vld [vmem:[%s559_s3 + $0x88] sm:$0xff]  ;;  %v174_v21 = vld [vmem:[%s559_s3 + $0x110] sm:$0xff]  ;;  %v156_v22 = vld [vmem:[%s559_s3 + $0x80] sm:$0xff] }
  0x1e   :  { %91 = vmatpush.msra.mxu0 %v24_v47  ;;  %131 = vmatpush.msra.mxu2 %v26_v49  ;;  %v173_v23 = vld [vmem:[%s559_s3 + $0x108] sm:$0xff]  ;;  %v172_v24 = vld [vmem:[%s559_s3 + $0x100] sm:$0xff] }
  0x1f   :  { %111 = vmatpush.msra.mxu1 %v25_v52  ;;  %195 = vmatpush.msra.mxu3 %v145_v63  ;;  %v69_v25 = vld [vmem:[%s561_s2] sm:$0x7] }
  0x20   :  { %92 = vmatpush.msra.mxu0 %v21_v51  ;;  %132 = vmatpush.msra.mxu2 %v23_v54  ;;  %v71_v26 = vperm.slane %v69_v25, 0  ;;  %v72_v27 = vperm.slane %v69_v25, 1  ;;  %v73_v33 = vperm.slane %v69_v25, 2  ;;  %v180_v38 = vld [vmem:[%s562_s4] sm:$0x1] }
  0x21   :  { %93 = vmatmul.f32.vlgmr.msra.gmra.mxu0 %v20_v53  ;;  %133 = vmatmul.f32.vlgmr.msra.gmra.mxu2 %v20_v53 }
  0x22   :  { %112 = vmatpush.msra.mxu1 %v22_v55  ;;  %205 = vmatpush.msrb.mxu0 %v171_v56 }
  0x23   :  { %113 = vmatmul.f32.vlgmr.msra.gmra.mxu1 %v20_v53  ;;  %196 = vmatpush.msra.mxu3 %v144_v1 }
  0x24   :  { %206 = vmatpush.msrb.mxu0 %v170_v58  ;;  %233 = vmatpush.msrb.mxu1 %v179_v9 }
  0x25   :  { %197 = vmatpush.msra.mxu3 %v143_v3 }
  0x26   :  { %207 = vmatpush.msrb.mxu0 %v169_v60  ;;  %234 = vmatpush.msrb.mxu1 %v178_v12 }
  0x27   :  { %198 = vmatpush.msra.mxu3 %v142_v7 }
  0x28   :  { %208 = vmatpush.msrb.mxu0 %v168_v62  ;;  %235 = vmatpush.msrb.mxu1 %v177_v15 }
  0x29   :  { %199 = vmatpush.msra.mxu3 %v141_v10 }
  0x2a   :  { %209 = vmatpush.msrb.mxu0 %v167_v0  ;;  %236 = vmatpush.msrb.mxu1 %v176_v17 }
  0x2b   :  { %200 = vmatpush.msra.mxu3 %v140_v13 }
  0x2c   :  { %210 = vmatpush.msrb.mxu0 %v166_v2  ;;  %237 = vmatpush.msrb.mxu1 %v175_v19 }
  0x2e   :  { %211 = vmatpush.msrb.mxu0 %v165_v4  ;;  %238 = vmatpush.msrb.mxu1 %v174_v21 }
  0x30   :  { %212 = vmatpush.msrb.mxu0 %v164_v5  ;;  %239 = vmatpush.msrb.mxu1 %v173_v23 }
  0x32   :  { %213 = vmatpush.msrb.mxu0 %v163_v6  ;;  %240 = vmatpush.msrb.mxu1 %v172_v24 }
  0x34   :  { %214 = vmatpush.msrb.mxu0 %v162_v8 }
  0x36   :  { %215 = vmatpush.msrb.mxu0 %v161_v11 }
  0x38   :  { %216 = vmatpush.msrb.mxu0 %v160_v14 }
  0x3a   :  { %217 = vmatpush.msrb.mxu0 %v159_v16 }
  0x3c   :  { %218 = vmatpush.msrb.mxu0 %v158_v18 }
  0x3e   :  { %219 = vmatpush.msrb.mxu0 %v157_v20 }
  0x40   :  { %220 = vmatpush.msrb.mxu0 %v156_v22 }
  0x9e   :  { %v94_v28 = vpop.f32.mrf.mxu0 }
  0x9f   :  { %v95_v29 = vadd.f32 %v94_v28, %v71_v26 }
  0xa0   :  { %v114_v30 = vpop.f32.mrf.mxu1 }
  0xa1   :  { %v137_v31 = vmax.f32 %v95_v29, 0.0  ;;  %v115_v32 = vadd.f32 %v114_v30, %v72_v27 }
  0xa3   :  { %201 = vmatmul.f32.vlgmr.msra.gmra.mxu3 %v137_v31  ;;  %v138_v34 = vmax.f32 %v115_v32, 0.0 }
  0xa4   :  { %v134_v35 = vpop.f32.mrf.mxu2 }
  0xa5   :  { %221 = vmatmul.f32.vlgmr.msrb.gmra.mxu0 %v138_v34  ;;  %v135_v36 = vadd.f32 %v134_v35, %v73_v33 }
  0xa7   :  { %v139_v37 = vmax.f32 %v135_v36, 0.0 }
  0xa9   :  { %251 = vmatmul.msk.f32.vlgmr.msrb.gmra.mxu1 %vm181_vm0, %v139_v37 }
 0x122   :  { %v222_v40 = vpop.f32.mrf.mxu0 }
 0x126   :  { %v202_v39 = vpop.f32.mrf.mxu3  ;;  %v242_v42 = vpop.f32.mrf.mxu1 }
 0x127   :  { %v203_v41 = vadd.f32 %v202_v39, %v180_v38 }
 0x129   :  { %v223_v43 = vadd.f32 %v222_v40, %v203_v41 }
 0x12b   :  { %v243_v44 = vadd.f32 %v242_v42, %v223_v43 }
 0x12d   :  { %246 = vst.msk [vmem:[%s563_s5] sm:$0x1] %vm245_vm1, %v243_v44 }

</bundles_post_ra>
